<compile_context>
chip_gen: v5e
topology: v5e:2x2
jax: 0.10.0
libtpu: 0.0.40
codegen_flags: <defaults>
</compile_context>

<pallas_src>
import functools

import jax
import jax.numpy as jnp
from jax.experimental import pallas as pl
from jax.experimental.pallas import tpu as pltpu


def _mean_dim1_kernel(x_ref, o_ref, acc_ref, *, inv_c):
    # x_ref:   (t_n, t_c, t_hw)  input block
    # o_ref:   (t_n, 1,  t_hw)   output block (same block for all k -> resident)
    # acc_ref: (t_n, 1,  t_hw)   f32 accumulator scratch
    k = pl.program_id(2)

    @pl.when(k == 0)
    def _():
        acc_ref[...] = jnp.zeros_like(acc_ref)

    # Channel reduction in f32 without materializing an f32 copy of the block
    # (sublane/VPU-XLU reduction; no MXU — kernel is HBM-bandwidth bound).
    acc_ref[...] += jnp.sum(x_ref[...], axis=1, keepdims=True, dtype=jnp.float32)

    @pl.when(k == pl.num_programs(2) - 1)
    def _():
        # Multiply by the precomputed reciprocal instead of a vector divide.
        o_ref[...] = (acc_ref[...] * inv_c).astype(o_ref.dtype)


def _largest_divisor_leq(x, cap, multiple):
    """Largest multiple of `multiple` that divides `x` and is <= cap, or None."""
    t = (min(cap, x) // multiple) * multiple
    while t >= multiple:
        if x % t == 0:
            return t
        t -= multiple
    return None


def _budgets():
    """Per-generation (input-block budget bytes, max HW tile width)."""
    kind = ""
    try:
        kind = jax.devices()[0].device_kind.lower()
    except Exception:
        pass
    if "v5 lite" in kind or "v5e" in kind or "v5litepod" in kind:
        # v5e: 16 MiB default scoped VMEM, ~820 GB/s HBM — modest tiles are
        # already at roofline; keep the double-buffered footprint small.
        return 6 << 20, 2048
    # v6e / v7x (and unknown): bigger blocks amortize per-step overhead; total
    # residency is bounded below via an explicit vmem_limit_bytes, kept well
    # under v7x's 64 MiB physical VMEM.
    return 10 << 20, 4096


def _pick_hw_tile(hw, hw_max):
    """Largest multiple of 128 dividing hw and <= hw_max; full hw otherwise."""
    if hw % 128 != 0:
        # (8,128) rule: last block dim must be a multiple of 128 or the full
        # array dim — take the full dim; the channel tile absorbs the budget.
        return hw
    if hw <= hw_max:
        return hw
    t = _largest_divisor_leq(hw, hw_max, 128)
    return t if t is not None else hw


def _pick_c_tile(c, t_hw, elem, sub, budget):
    """Channel tile: 8-sublane hard rule, dtype packing multiple preferred,
    sized to keep the input block within `budget` bytes."""
    if c % 8 != 0:
        return c  # hard layout constraint: must take the full channel dim
    cap = max(sub, budget // max(1, t_hw * elem))
    t = _largest_divisor_leq(c, cap, sub) if c % sub == 0 else None
    if t is None:
        t = _largest_divisor_leq(c, max(8, budget // max(1, t_hw * elem)), 8)
    return t if t is not None else c


def mean_dim1(x):
    """x.mean(dim=1) for an NCHW tensor, computed with a Pallas TPU kernel."""
    n, c, h, w = x.shape
    hw = h * w
    elem = x.dtype.itemsize
    sub = max(8, 32 // elem)  # sublane packing multiple: 8 f32 / 16 bf16 / 32 int8

    budget, hw_max = _budgets()

    # Lane-dense layout: flatten spatial dims so the lane axis is H*W
    # (free reshape for a contiguous NCHW tensor).
    x2 = x.reshape(n, c, hw)

    t_hw = _pick_hw_tile(hw, hw_max)
    t_c = _pick_c_tile(c, t_hw, elem, sub, budget)
    # If a forced full-C (c % 8 != 0) or minimum-C block still exceeds the
    # budget, shrink the HW tile rather than silently oversubscribing VMEM.
    while t_c * t_hw * elem > budget and hw % 128 == 0 and t_hw > 128:
        nt = _largest_divisor_leq(hw, max(128, t_hw // 2), 128)
        if nt is None or nt >= t_hw:
            break
        t_hw = nt
        t_c = _pick_c_tile(c, t_hw, elem, sub, budget)

    n_hw = hw // t_hw

    # Batch tile: amortize per-step overhead when the per-step payload is tiny,
    # but keep >= 2 steps on the parallel axes so v7x's second TensorCore has
    # work (no effect on single-TC v5e/v6e).
    t_n = 1
    blk = t_c * t_hw * elem
    if blk < (1 << 20) and n > 1:
        target = max(1, (2 << 20) // blk)
        cap = n if n_hw >= 2 else max(1, n // 2)
        t_n = _largest_divisor_leq(n, max(1, min(cap, target)), 1) or 1

    # Megacore: single batch block and single HW tile -> split HW in two.
    if (n // t_n) * n_hw < 2 and hw % 256 == 0:
        nt = _largest_divisor_leq(hw, hw // 2, 128)
        if nt is not None:
            t_hw = nt
            n_hw = hw // t_hw

    grid = (n // t_n, n_hw, c // t_c)

    in_block_b = t_n * t_c * t_hw * elem
    out_block_b = t_n * t_hw * elem
    scratch_b = t_n * t_hw * 4
    # 2x double-buffered input + 2x output + scratch + slack; floor at 28 MiB
    # (safe on every generation, < v7x's 64 MiB physical VMEM).
    vmem_limit = min(
        max(2 * in_block_b + 2 * out_block_b + scratch_b + (2 << 20), 28 << 20),
        60 << 20,
    )

    kernel = functools.partial(_mean_dim1_kernel, inv_c=1.0 / c)

    out = pl.pallas_call(
        kernel,
        out_shape=jax.ShapeDtypeStruct((n, 1, hw), x.dtype),
        grid_spec=pltpu.PrefetchScalarGridSpec(
            num_scalar_prefetch=0,
            grid=grid,
            in_specs=[
                # (t_n, t_c, t_hw): t_c is a multiple of 8 or full C,
                # t_hw is a multiple of 128 or full H*W.
                pl.BlockSpec((t_n, t_c, t_hw), lambda i, j, k: (i, k, j)),
            ],
            # Same output block for every k -> stays resident across the C
            # reduction; HBM writeback happens once per (batch, spatial) tile.
            out_specs=pl.BlockSpec((t_n, 1, t_hw), lambda i, j, k: (i, 0, j)),
            scratch_shapes=[pltpu.VMEM((t_n, 1, t_hw), jnp.float32)],
        ),
        compiler_params=pltpu.CompilerParams(
            dimension_semantics=("parallel", "parallel", "arbitrary"),
            vmem_limit_bytes=int(vmem_limit),
        ),
        cost_estimate=pl.CostEstimate(
            flops=n * c * hw,
            transcendentals=0,
            bytes_accessed=n * c * hw * elem + n * hw * elem,
        ),
    )(x2)

    return out.reshape(n, h, w)


if __name__ == "__main__":
    key = jax.random.PRNGKey(0)
    x = jax.random.normal(key, (2, 4, 16, 16), dtype=jnp.float32)

    y = mean_dim1(x)
    y = jax.block_until_ready(y)

    y_ref = jnp.mean(x, axis=1)
    assert y.shape == y_ref.shape, (y.shape, y_ref.shape)
    assert jnp.allclose(y, y_ref, atol=1e-5, rtol=1e-5), "mismatch vs jnp.mean"

    print("KERNEL_OK")
</pallas_src>

<mosaic_0001>
module attributes {stable_mosaic.version = 11 : i64} {
  func.func @_mean_dim1_kernel(%arg0: i32, %arg1: i32, %arg2: i32, %arg3: memref<1x4x256xf32, #tpu.memory_space<vmem>>, %arg4: memref<1x1x256xf32, #tpu.memory_space<vmem>>, %arg5: memref<1x1x256xf32, #tpu.memory_space<vmem>>) attributes {dimension_semantics = [#tpu.dimension_semantics<parallel>, #tpu.dimension_semantics<parallel>, #tpu.dimension_semantics<arbitrary>], iteration_bounds = array<i64: 2, 1, 1>, scalar_prefetch = 0 : i64, scratch_operands = 1 : i64, tpu.core_type = #tpu.core_type<tc>, window_params = [{transform_indices = @transform_0, window_bounds = array<i64: 1, 4, 256>}, {transform_indices = @transform_1, window_bounds = array<i64: 1, 1, 256>}]} {
    %c0_i32 = arith.constant 0 : i32
    %0 = arith.cmpi eq, %arg2, %c0_i32 : i32
    %1 = arith.extui %0 : i1 to i32
    %c0_i32_0 = arith.constant 0 : i32
    %2 = arith.cmpi ne, %1, %c0_i32_0 : i32
    scf.if %2 {
      %cst_11 = arith.constant 0.000000e+00 : f32
      %12 = vector.broadcast %cst_11 : f32 to vector<1x1x256xf32>
      %c0_12 = arith.constant 0 : index
      %c0_13 = arith.constant 0 : index
      %c0_14 = arith.constant 0 : index
      %13 = vector.load %arg5[%c0_12, %c0_13, %c0_14] : memref<1x1x256xf32, #tpu.memory_space<vmem>>, vector<1x1x256xf32>
      tpu.vector_store %arg5[%c0_12, %c0_13, %c0_14], %12 {strides = array<i32>} : memref<1x1x256xf32, #tpu.memory_space<vmem>>, vector<1x1x256xf32>,
    } else {
    }
    %c0 = arith.constant 0 : index
    %c0_1 = arith.constant 0 : index
    %c0_2 = arith.constant 0 : index
    %3 = vector.load %arg5[%c0, %c0_1, %c0_2] : memref<1x1x256xf32, #tpu.memory_space<vmem>>, vector<1x1x256xf32>
    %c0_3 = arith.constant 0 : index
    %c0_4 = arith.constant 0 : index
    %c0_5 = arith.constant 0 : index
    %4 = vector.load %arg3[%c0_3, %c0_4, %c0_5] : memref<1x4x256xf32, #tpu.memory_space<vmem>>, vector<1x4x256xf32>
    %cst = arith.constant dense<0.000000e+00> : vector<1x256xf32>
    %5 = vector.multi_reduction <add>, %4, %cst [1] : vector<1x4x256xf32> to vector<1x256xf32>
    %6 = vector.shape_cast %5 : vector<1x256xf32> to vector<1x1x256xf32>
    %7 = arith.addf %3, %6 : vector<1x1x256xf32>
    %c0_6 = arith.constant 0 : index
    %c0_7 = arith.constant 0 : index
    %c0_8 = arith.constant 0 : index
    %8 = vector.load %arg5[%c0_6, %c0_7, %c0_8] : memref<1x1x256xf32, #tpu.memory_space<vmem>>, vector<1x1x256xf32>
    tpu.vector_store %arg5[%c0_6, %c0_7, %c0_8], %7 {strides = array<i32>} : memref<1x1x256xf32, #tpu.memory_space<vmem>>, vector<1x1x256xf32>,
    %c0_i32_9 = arith.constant 0 : i32
    %9 = arith.cmpi eq, %arg2, %c0_i32_9 : i32
    %10 = arith.extui %9 : i1 to i32
    %c0_i32_10 = arith.constant 0 : i32
    %11 = arith.cmpi ne, %10, %c0_i32_10 : i32
    scf.if %11 {
      %c0_11 = arith.constant 0 : index
      %c0_12 = arith.constant 0 : index
      %c0_13 = arith.constant 0 : index
      %12 = vector.load %arg5[%c0_11, %c0_12, %c0_13] : memref<1x1x256xf32, #tpu.memory_space<vmem>>, vector<1x1x256xf32>
      %cst_14 = arith.constant 2.500000e-01 : f32
      %13 = vector.broadcast %cst_14 : f32 to vector<1x1x256xf32>
      %14 = arith.mulf %12, %13 : vector<1x1x256xf32>
      %c0_15 = arith.constant 0 : index
      %c0_16 = arith.constant 0 : index
      %c0_17 = arith.constant 0 : index
      %15 = vector.load %arg4[%c0_15, %c0_16, %c0_17] : memref<1x1x256xf32, #tpu.memory_space<vmem>>, vector<1x1x256xf32>
      tpu.vector_store %arg4[%c0_15, %c0_16, %c0_17], %14 {strides = array<i32>} : memref<1x1x256xf32, #tpu.memory_space<vmem>>, vector<1x1x256xf32>,
    } else {
    }
    return
  }
  func.func @transform_0(%arg0: i32, %arg1: i32, %arg2: i32) -> (i32, i32, i32) {
    %c0_i32 = arith.constant 0 : i32
    return %arg0, %arg2, %arg1 : i32, i32, i32
  }
  func.func @transform_1(%arg0: i32, %arg1: i32, %arg2: i32) -> (i32, i32, i32) {
    %c0_i32 = arith.constant 0 : i32
    %c0_i32_0 = arith.constant 0 : i32
    return %arg0, %c0_i32, %arg1 : i32, i32, i32
  }
}

</mosaic_0001>

<bundles_post_ra>
// kernel: tpu_custom_call.1
= control target key start
LH: loop header
LB: loop body
LE: loop exit
PB: predicated region body
PF: predicated region fallthrough
CT: control target
= control target key end

     0   :  { %6 = vsyncpa [#allocation4], 0  ;;  %s656_s0 = inlined_call_operand.hbm [shape: f32[2,4,256], index: 0, kind: input, shape index: {}]   ;;  %s657_s1 = inlined_call_operand.hbm [shape: f32[2,1,256], index: 1, kind: output, shape index: {}]  }
   0x1   :  { %8 = vsyncpa [#allocation4 + $0x1], 0 }
   0x2   :  { %9 = vsyncpa [#allocation5], 0 }
   0x3   :  { %11 = vsyncpa [#allocation5 + $0x1], 0  ;;  %s525_s6 = smov 0   ;;  %s527_s7 = smov 0  }
   0x4   :  { %s529_s8 = smov 0   ;;  %s531_s9 = smov 0  }
   0x5   :  { %s533_s10 = smov 0   ;;  %s535_s11 = smov 0  }
   0x6 LB: > { %s322_s12 = sadd.s32 4294967295, %s512_s11   ;;  %s323_s13 = sadd.s32 4294967294, %s512_s11   ;;  %s512_s11 = sphi %s535_s11, %s17_s11   ;;  %s508_s10 = sphi %s533_s10, %s668_s10   ;;  %s504_s9 = sphi %s531_s9, %s667_s9   ;;  %s500_s8 = sphi %s529_s8, %s666_s8   ;;  %s496_s7 = sphi %s527_s7, %s665_s7   ;;  %s492_s6 = sphi %s525_s6, %s664_s6  }
   0x7   : > { %s36_s14 = sadd.s32 1, %s508_s10  ;;  %s47_s15 = sadd.s32 1, %s500_s8 }
   0x8   : > { %p38_p0 = scmp.ge.s32.totalorder %s36_s14, 2  ;;  %p54_p1 = scmp.ne.s32.totalorder %s500_s8, %s496_s7 }
   0x9   : > { %p55_p2 = scmp.eq.s32.totalorder %s512_s11, 0  ;;  %p60_p3 = scmp.ne.s32.totalorder %s496_s7, %s492_s6 }
   0xa   : > { %s670_s14 = smov (%p38_p0, %s36_s14), 0  ;;  %p61_p5 = scmp.eq.s32.totalorder %s322_s12, 0 }
   0xb   : > { %p566_p4 = por %p55_p2, %p54_p1  ;;  %s40_s17 = ssub.s32 %s508_s10, %s670_s14 }
   0xc   : > { %p86_p6 = scmp.eq.s32.totalorder %s322_s12, 1  ;;  %p45_p7 = scmp.eq.s32.totalorder %s40_s17, 0 }
   0xd   : > { %p572_p8 = por %p61_p5, %p60_p3  ;;  %p92_p10 = scmp.eq.s32.totalorder %s323_s13, 1 }
   0xe   : > { %p576_p9 = por %p86_p6, %p54_p1  ;;  %p325_p12 = scmp.ge.s32.totalorder %s512_s11, 2 }
   0xf   : > { %s581_s20 = scalar_select %p45_p7, %s500_s8, %s47_s15  }
  0x10   : > { %p583_p11 = por %p92_p10, %p60_p3  ;;  %p349_p13 = scmp.lt.s32.totalorder %s512_s11, 2 }
  0x11   : > { %s112_s22 = sand.u32 1, %s500_s8   ;;  %s336_s24 = sshll.u32 %s508_s10, 3 }
  0x12   : > { %s326_s23 = sshll.u32 %s112_s22, 3  ;;  %s125_s27 = scalar_lea.hbm %s656_s0, %s336_s24 }
  0x13   : > { %s116_s28 = scalar_lea.vmem [#allocation3], %s326_s23  ;;  %s127_s30 = sshll.u32 %s125_s27, 4  ;;  %s128_s30 = int_to_ptr.hbm [resolvable:$true] %s127_s30 }
  0x14   : > { %s129_s29 = sshll.u32 %s116_s28, 4  ;;  %p342_p0 = pnand %p349_p13, %p566_p4  ;;  %s130_s29 = int_to_ptr.vmem [resolvable:$true] %s129_s29 }
  0x15   : > { %p329_p1 = scmp.ge.s32.totalorder %s512_s11, 1  ;;  %p134_p2 = scmp.lt.s32.totalorder %s512_s11, 3 }
  0x16   : > { %s113_s2 = scalar_lea.sflag [#allocation4], %s112_s22 }
  0x17   : > { %344 = dma.hbm_to_vmem [thread:$0]  (!%p342_p0), %s128_s30, 128, %s130_s29, %s113_s2  }
  0x18   : > { %p135_p3 = pnand %p329_p1, %p134_p2 }
  0x19   : > { %s599_s3 = sand.u32 (!%p135_p3), 1, %s496_s7  }
  0x1a   : > { %138 = sbr.rel (%p135_p3) target bundleno = 72 (0x48), region = 24  ;;  %s330_s4 = sshll.u32 (!%p135_p3), %s599_s3, 3 }
  0x1b   : > { %s141_s5 = scalar_lea.sflag (!%p135_p3), [#allocation4], %s599_s3  ;;  %s144_s12 = scalar_lea.vmem (!%p135_p3), [#allocation3], %s330_s4 }
  0x1f   : > { %483 = dma.done.wait (%p572_p8), %s141_s5, 128  }
  0x20   : > { %485 = vsyncadd (%p572_p8), %s141_s5, 4294967168  ;;  %v170_v0 = vlaneseq  ;;  %v514_v2 = vmov 0.0   ;;  %v176_v3 = vld [vmem:[%s144_s12] sm:$0xff]  ;;  %vm183_vm1 = vcmask 1043456   ;;  %vm201_vm2 = vcmask 1040384   ;;  %s331_s13 = sshll.u32 %s599_s3, 1 }
  0x21   : > { %178 = vst [vmem:[#allocation1] ss:$2 sm:$0xff] %v176_v3  ;;  %s333_s15 = sshll.u32 %s504_s9, 1  ;;  %s163_s22 = scalar_lea.vmem [#allocation6], %s331_s13 }
  0x22   : > { %vm607_vm0 = vcmp.lt.s32.totalorder %v170_v0, 256  ;;  %s229_s18 = scalar_lea.hbm %s657_s1, %s333_s15  ;;  %s231_s23 = sshll.u32 %s163_s22, 4  ;;  %s232_s23 = int_to_ptr.vmem [resolvable:$true] %s231_s23 }
  0x23   : > { %174 = vst.msk [vmem:[#allocation2] sm:$0x3] %vm607_vm0, %v514_v2  ;;  %s233_s24 = sshll.u32 %s229_s18, 4  ;;  %s217_s25 = scalar_lea.sflag [#allocation5], %s599_s3  ;;  %s234_s24 = int_to_ptr.hbm [resolvable:$true] %s233_s24 }
  0x24   : > { %s444_s9 = sshra.s32 %s234_s24, 4  ;;  %s450_s29 = scalar_lea.hbm %s657_s1, 4  ;;  %s445_s9 = int_to_ptr.hbm [resolvable:$true] %s444_s9 }
  0x25   : > { %s446_s26 = scalar_lea.hbm %s445_s9, 2  ;;  %p451_p7 = scmp.lt.s32.totalorder %s445_s9, %s657_s1 }
  0x26   : > { %p447_p4 = scmp.ne.s32.totalorder %s445_s9, %s446_s26  ;;  %p452_p8 = scmp.lt.s32.totalorder %s450_s29, %s446_s26 }
  0x28   : > { %v179_v4 = vld.sshfl [vmem:[#allocation1] sm:$0xff pattern:$0x75316420]  ;;  %v180_v5 = vld.sshfl [vmem:[#allocation1 + $0x8] sm:$0xff pattern:$0x75316420]  ;;  %p448_p5 = pnand %p447_p4, %p576_p9  ;;  %p453_p10 = por %p452_p8, %p451_p7 }
  0x29   : > { %v184_v6 = vsel %vm183_vm1, %v179_v4, 0.0  ;;  %v191_v7 = vsel %vm183_vm1, %v180_v5, 0.0 }
  0x2a   : > { %v185_v8 = vrot.slane %v184_v6, 4  ;;  %v192_v9 = vrot.slane %v191_v7, 4  ;;  %v175_v19 = vld [vmem:[#allocation2] sm:$0x3]  ;;  %p449_p6 = pneg %p448_p5 }
  0x2c   : > { %v186_v10 = vadd.f32 %v185_v8, %v184_v6  ;;  %v193_v11 = vadd.f32 %v192_v9, %v191_v7  ;;  %p454_p13 = pnand %p453_p10, %p449_p6 }
  0x2e   : > { %v187_v12 = vrot.slane %v186_v10, 2  ;;  %v194_v13 = vrot.slane %v193_v11, 2 }
  0x30   : > { %v188_v14 = vadd.f32 %v187_v12, %v186_v10  ;;  %v195_v15 = vadd.f32 %v194_v13, %v193_v11 }
  0x32   : > { %v189_v16 = vrot.slane %v188_v14, 1  ;;  %v196_v17 = vrot.slane %v195_v15, 1 }
  0x34   : > { %v197_v18 = vadd.f32 %v196_v17, %v195_v15  ;;  %v190_v20 = vadd.f32 %v189_v16, %v188_v14 }
  0x36   : > { %v200_v21 = vrot.slane %v197_v18, 7 }
  0x38   : > { %v202_v22 = vsel %vm201_vm2, %v190_v20, %v200_v21 }
  0x39   : > { %v204_v23 = vadd.f32 %v202_v22, %v175_v19 }
  0x3b   : > { %209 = vst.msk [vmem:[#allocation2] sm:$0x3] %vm607_vm0, %v204_v23 }
  0x42   : > { %v213_v24 = vld [vmem:[#allocation2] sm:$0x3] }
  0x43   : > { %v214_v25 = vmul.f32 0.25, %v213_v24 }
  0x45   : > { %215 = vst.msk [vmem:[%s163_s22] sm:$0x3] %vm607_vm0, %v214_v25 }
  0x46   : > { %457 = shalt.err (!%p454_p13)
}
  0x47   : > { %339 = dma.vmem_to_hbm [thread:$0]  (%p576_p9), %s232_s23, 32, %s234_s24, %s217_s25  }
  0x48 PF: > { %s245_s3 = sand.u32 1, %s492_s6   ;;  %p346_p0 = pnand %p325_p12, %p583_p11 }
  0x49   : > { %s246_s4 = scalar_lea.sflag [#allocation5], %s245_s3 }
  0x4a   : > { %p347_p1 = pneg %p346_p0 }
  0x4c   : > { %487 = dma.done.wait (%p347_p1), %s246_s4, 32  }
  0x4d   : > { %489 = vsyncadd (%p347_p1), %s246_s4, 4294967264  ;;  %s17_s11 = sadd.s32 1, %s512_s11   ;;  %s664_s6 = smov %s496_s7 }
  0x4e   : > { %p14_p2 = scmp.ge.s32.totalorder %s17_s11, 4   ;;  %s665_s7 = smov %s500_s8 }
  0x4f   : > { %s666_s8 = smov %s581_s20  ;;  %s667_s9 = smov %s508_s10 }
  0x50   : > { %s668_s10 = smov %s670_s14  ;;  %16 = sbr.rel (!%p14_p2) target bundleno = 6 (0x6), region = 77 }
  0x55   :  { %252 = vsyncpa [#allocation4], 1 }
  0x56   :  { %254 = vsyncpa [#allocation4 + $0x1], 1 }
  0x57   :  { %255 = vsyncpa [#allocation5], 1 }
  0x58   :  { %257 = vsyncpa [#allocation5 + $0x1], 1 }

</bundles_post_ra>
